<compile_context>
chip_gen: v7x
topology: tpu7x:2x2x1
jax: 0.10.0
libtpu: 0.0.40
codegen_flags: <defaults>
</compile_context>

<pallas_src>
import functools

import jax
import jax.numpy as jnp
from jax.experimental import pallas as pl
from jax.experimental.pallas import tpu as pltpu


_ROWS = 8                 # (b, c) rows per grid step (sublane-dense)
_LANES = 128              # lane width
_CHUNK_MAX = 32 * 1024    # max spatial lanes per block (1 MiB f32 per buffer)


def _round_up(x, m):
    return ((x + m - 1) // m) * m


def _ncc_sums_kernel(f_ref, m_ref, sums_ref, mask_ref):
    """One (row_tile, spatial_chunk) step.

    f_ref, m_ref : (ROWS, CHUNK) f32 tiles.
    sums_ref     : (ROWS, 128) f32 accumulator (lanes 0..7 hold the 8 sums),
                   resident across the spatial-chunk grid axis.
    mask_ref     : (ROWS, CHUNK) int8 overlap mask for this chunk.
    """
    j = pl.program_id(1)

    f = f_ref[...]
    m = m_ref[...]

    # Sector / overlap mask: 1 where BOTH volumes are nonzero.
    nz = jnp.logical_and(f != 0.0, m != 0.0)
    mask_ref[...] = nz.astype(jnp.int8)
    k = nz.astype(jnp.float32)

    fk = f * k
    mk = m * k

    def rsum(x):
        return jnp.sum(x, axis=-1, keepdims=True)   # (ROWS, 1)

    s_f = rsum(f)          # sum f           (unmasked, for the mean)
    s_m = rsum(m)          # sum m
    s_ff = rsum(fk * f)    # sum mask * f^2
    s_mm = rsum(mk * m)    # sum mask * m^2
    s_fm = rsum(fk * m)    # sum mask * f*m
    s_kf = rsum(fk)        # sum mask * f
    s_km = rsum(mk)        # sum mask * m
    s_k = rsum(k)          # sum mask

    # Pack the 8 per-row scalars into lanes 0..7 of a full-width (ROWS, 128)
    # slab so the accumulator store stays lane-dense (no masked partial vst).
    lane = jax.lax.broadcasted_iota(jnp.int32, sums_ref.shape, 1)
    partial = (jnp.where(lane == 0, s_f, 0.0)
               + jnp.where(lane == 1, s_m, 0.0)
               + jnp.where(lane == 2, s_ff, 0.0)
               + jnp.where(lane == 3, s_mm, 0.0)
               + jnp.where(lane == 4, s_fm, 0.0)
               + jnp.where(lane == 5, s_kf, 0.0)
               + jnp.where(lane == 6, s_km, 0.0)
               + jnp.where(lane == 7, s_k, 0.0))

    @pl.when(j == 0)
    def _():
        sums_ref[...] = jnp.zeros_like(sums_ref)

    sums_ref[...] += partial


def _run_ncc_kernel(f2, m2, chunk):
    BC_pad, S_pad = f2.shape
    grid = (BC_pad // _ROWS, S_pad // chunk)
    sums, mask_i8 = pl.pallas_call(
        _ncc_sums_kernel,
        out_shape=(
            jax.ShapeDtypeStruct((BC_pad, _LANES), jnp.float32),
            jax.ShapeDtypeStruct((BC_pad, S_pad), jnp.int8),
        ),
        grid=grid,
        in_specs=[
            pl.BlockSpec((_ROWS, chunk), lambda i, j: (i, j)),
            pl.BlockSpec((_ROWS, chunk), lambda i, j: (i, j)),
        ],
        out_specs=(
            pl.BlockSpec((_ROWS, _LANES), lambda i, j: (i, 0)),   # accumulator
            pl.BlockSpec((_ROWS, chunk), lambda i, j: (i, j)),
        ),
        compiler_params=pltpu.CompilerParams(
            dimension_semantics=("parallel", "arbitrary"),
            vmem_limit_bytes=48 * 1024 * 1024,
        ),
    )(f2, m2)
    return sums, mask_i8


@functools.partial(
    jax.jit,
    static_argnames=("reduction", "use_regularization", "mask_dtype"))
def masked_ncc(fixed_patch, moving_patch, predicted_theta, weight,
               reduction="mean", use_regularization=True,
               mask_dtype=jnp.float32):
    """Forward pass of MaskedNCC.

    fixed_patch, moving_patch: [B, C, D, H, W] float32
    predicted_theta:           [B, 3, 4] float32
    Returns (loss, 1 - ncc, mask) matching the PyTorch module.
    """
    B, C, D, H, W = fixed_patch.shape
    S = D * H * W
    BC = B * C

    # ---- layout: (B*C) rows x S lanes, padded for (8, 128)-dense tiling ----
    BC_pad = _round_up(BC, _ROWS)
    S128 = _round_up(S, _LANES)
    n_chunks = -(-S128 // _CHUNK_MAX)                  # cdiv
    chunk = _round_up(-(-S128 // n_chunks), _LANES)    # minimize pad waste
    S_pad = chunk * n_chunks

    f2 = fixed_patch.astype(jnp.float32).reshape(BC, S)
    m2 = moving_patch.astype(jnp.float32).reshape(BC, S)
    if BC_pad != BC or S_pad != S:
        # Padded voxels are zero in both volumes -> mask == 0 there, so they
        # drop out of every masked sum; N below stays the true voxel count S.
        f2 = jnp.pad(f2, ((0, BC_pad - BC), (0, S_pad - S)))
        m2 = jnp.pad(m2, ((0, BC_pad - BC), (0, S_pad - S)))

    sums, mask_i8 = _run_ncc_kernel(f2, m2, chunk)

    # ---- tiny per-row scalar epilogue (fused JAX glue) ----
    s = sums[:BC]
    Sf, Sm = s[:, 0], s[:, 1]
    Sff, Smm, Sfm = s[:, 2], s[:, 3], s[:, 4]
    Skf, Skm, Sk = s[:, 5], s[:, 6], s[:, 7]

    inv_n = 1.0 / float(S)
    # torch quirk reproduced exactly: mean over spatial, then divided by N again
    mf = Sf * (inv_n * inv_n)
    mm = Sm * (inv_n * inv_n)
    # sum(((f - mf) * mask)^2) etc., expanded so a single data pass suffices
    sum_fd2 = Sff - 2.0 * mf * Skf + mf * mf * Sk
    sum_md2 = Smm - 2.0 * mm * Skm + mm * mm * Sk
    num = Sfm - mf * Skm - mm * Skf + mf * mm * Sk
    fv = sum_fd2 * inv_n
    mv = sum_md2 * inv_n
    denom = jnp.sqrt(fv * mv) + jnp.float32(1e-7)
    ncc = (num / denom) * inv_n
    ncc = ncc.reshape(B, C)

    if reduction == "mean":
        ncc = jnp.mean(ncc, axis=0)
    elif reduction == "sum":
        ncc = jnp.sum(ncc, axis=0)
    # reduction None -> keep [B, C]

    mask = mask_i8[:BC, :S].reshape(B, C, D, H, W)
    if mask_dtype is not None and mask.dtype != mask_dtype:
        # Cast only to match the PyTorch module's float mask; downstream code
        # that can consume int8 should pass mask_dtype=jnp.int8.
        mask = mask.astype(mask_dtype)

    # regularization_loss (tiny 3x3 / 3x1 math -> plain JAX glue)
    w = jnp.float32(weight) if use_regularization else jnp.float32(0.0)
    IDT = jnp.eye(3, dtype=jnp.float32)[None]          # [1, 3, 3]
    A = predicted_theta[:, :, 0:3]                     # [B, 3, 3]
    b = predicted_theta[:, :, 3]                       # [B, 3]
    L_reg = w * (jnp.sum((A - IDT) ** 2) + jnp.sum(b ** 2))

    return 1.0 - ncc + L_reg, 1.0 - ncc, mask


def _reference(fixed, moving, theta, weight, reduction="mean", use_reg=True):
    """Pure-JAX reference mirroring the PyTorch code (for correctness check)."""
    mask = jnp.logical_and(fixed != 0, moving != 0).astype(jnp.float32)
    N = jnp.sum(jnp.ones_like(mask), axis=(2, 3, 4), keepdims=True)
    mf = jnp.mean(fixed, axis=(2, 3, 4), keepdims=True) / N
    mm = jnp.mean(moving, axis=(2, 3, 4), keepdims=True) / N
    fv = jnp.sum(((fixed - mf) * mask) ** 2, axis=(2, 3, 4), keepdims=True) / N
    mv = jnp.sum(((moving - mm) * mask) ** 2, axis=(2, 3, 4), keepdims=True) / N
    num = (fixed - mf) * mask * (moving - mm) * mask
    den = jnp.sqrt(fv * mv) + 1e-7
    ncc = jnp.mean(num / den, axis=(2, 3, 4))
    if reduction == "mean":
        ncc = jnp.mean(ncc, axis=0)
    elif reduction == "sum":
        ncc = jnp.sum(ncc, axis=0)
    w = weight if use_reg else 0.0
    IDT = jnp.eye(3, dtype=jnp.float32)[None]
    A = theta[:, :, 0:3]
    b = theta[:, :, 3]
    L_reg = w * (jnp.sum((A - IDT) ** 2) + jnp.sum(b ** 2))
    return 1.0 - ncc + L_reg, 1.0 - ncc, mask


if __name__ == "__main__":
    key = jax.random.PRNGKey(0)
    k1, k2, k3 = jax.random.split(key, 3)

    B, C, D, H, W = 2, 4, 8, 8, 8   # small shapes consistent with [B,C,D,H,W]
    fixed = jax.random.normal(k1, (B, C, D, H, W), dtype=jnp.float32)
    moving = jax.random.normal(k2, (B, C, D, H, W), dtype=jnp.float32)
    # Zero out parts of each volume to exercise the sector/overlap mask.
    fixed = fixed * (jax.random.uniform(k1, fixed.shape) > 0.2)
    moving = moving * (jax.random.uniform(k2, moving.shape) > 0.2)

    # predicted_theta: [B, 3, 4] deterministic, near-identity affine.
    base = jnp.concatenate([jnp.eye(3, dtype=jnp.float32),
                            jnp.zeros((3, 1), jnp.float32)], axis=1)  # [3,4]
    predicted_theta = base[None] + 0.01 * jax.random.normal(
        k3, (B, 3, 4), dtype=jnp.float32)

    weight = 0.5
    loss, one_minus_ncc, mask = masked_ncc(
        fixed, moving, predicted_theta, weight,
        reduction="mean", use_regularization=True)
    jax.block_until_ready((loss, one_minus_ncc, mask))

    ref_loss, ref_1mncc, ref_mask = _reference(
        fixed, moving, predicted_theta, weight, "mean", True)

    assert loss.shape == (C,) and one_minus_ncc.shape == (C,)
    assert mask.shape == (B, C, D, H, W)
    assert jnp.allclose(loss, ref_loss, atol=1e-5, rtol=1e-5)
    assert jnp.allclose(one_minus_ncc, ref_1mncc, atol=1e-5, rtol=1e-5)
    assert jnp.allclose(mask, ref_mask)

    print("KERNEL_OK")
</pallas_src>

<mosaic_0001>
module attributes {stable_mosaic.version = 11 : i64} {
  func.func @_ncc_sums_kernel(%arg0: i32, %arg1: i32, %arg2: memref<8x512xf32, #tpu.memory_space<vmem>>, %arg3: memref<8x512xf32, #tpu.memory_space<vmem>>, %arg4: memref<8x128xf32, #tpu.memory_space<vmem>>, %arg5: memref<8x512xi8, #tpu.memory_space<vmem>>) attributes {dimension_semantics = [#tpu.dimension_semantics<parallel>, #tpu.dimension_semantics<arbitrary>], iteration_bounds = array<i64: 1, 1>, scalar_prefetch = 0 : i64, scratch_operands = 0 : i64, tpu.core_type = #tpu.core_type<tc>, window_params = [{transform_indices = @transform_0, window_bounds = array<i64: 8, 512>}, {transform_indices = @transform_1, window_bounds = array<i64: 8, 512>}, {transform_indices = @transform_2, window_bounds = array<i64: 8, 128>}, {transform_indices = @transform_3, window_bounds = array<i64: 8, 512>}]} {
    %c0 = arith.constant 0 : index
    %c0_0 = arith.constant 0 : index
    %0 = vector.load %arg2[%c0, %c0_0] : memref<8x512xf32, #tpu.memory_space<vmem>>, vector<8x512xf32>
    %c0_1 = arith.constant 0 : index
    %c0_2 = arith.constant 0 : index
    %1 = vector.load %arg3[%c0_1, %c0_2] : memref<8x512xf32, #tpu.memory_space<vmem>>, vector<8x512xf32>
    %cst = arith.constant 0.000000e+00 : f32
    %2 = vector.broadcast %cst : f32 to vector<8x512xf32>
    %3 = arith.cmpf one, %0, %2 : vector<8x512xf32>
    %cst_3 = arith.constant 0.000000e+00 : f32
    %4 = vector.broadcast %cst_3 : f32 to vector<8x512xf32>
    %5 = arith.cmpf one, %1, %4 : vector<8x512xf32>
    %6 = arith.andi %3, %5 : vector<8x512xi1>
    %7 = arith.extui %6 : vector<8x512xi1> to vector<8x512xi8>
    %c0_4 = arith.constant 0 : index
    %c0_5 = arith.constant 0 : index
    %8 = vector.load %arg5[%c0_4, %c0_5] : memref<8x512xi8, #tpu.memory_space<vmem>>, vector<8x512xi8>
    tpu.vector_store %arg5[%c0_4, %c0_5], %7 {strides = array<i32>} : memref<8x512xi8, #tpu.memory_space<vmem>>, vector<8x512xi8>,
    %9 = arith.extui %6 : vector<8x512xi1> to vector<8x512xi32>
    %10 = arith.sitofp %9 : vector<8x512xi32> to vector<8x512xf32>
    %11 = arith.mulf %0, %10 : vector<8x512xf32>
    %12 = arith.mulf %1, %10 : vector<8x512xf32>
    %cst_6 = arith.constant dense<0.000000e+00> : vector<8xf32>
    %13 = vector.multi_reduction <add>, %0, %cst_6 [1] : vector<8x512xf32> to vector<8xf32>
    %14 = vector.shape_cast %13 : vector<8xf32> to vector<8x1xf32>
    %cst_7 = arith.constant dense<0.000000e+00> : vector<8xf32>
    %15 = vector.multi_reduction <add>, %1, %cst_7 [1] : vector<8x512xf32> to vector<8xf32>
    %16 = vector.shape_cast %15 : vector<8xf32> to vector<8x1xf32>
    %17 = arith.mulf %11, %0 : vector<8x512xf32>
    %cst_8 = arith.constant dense<0.000000e+00> : vector<8xf32>
    %18 = vector.multi_reduction <add>, %17, %cst_8 [1] : vector<8x512xf32> to vector<8xf32>
    %19 = vector.shape_cast %18 : vector<8xf32> to vector<8x1xf32>
    %20 = arith.mulf %12, %1 : vector<8x512xf32>
    %cst_9 = arith.constant dense<0.000000e+00> : vector<8xf32>
    %21 = vector.multi_reduction <add>, %20, %cst_9 [1] : vector<8x512xf32> to vector<8xf32>
    %22 = vector.shape_cast %21 : vector<8xf32> to vector<8x1xf32>
    %23 = arith.mulf %11, %1 : vector<8x512xf32>
    %cst_10 = arith.constant dense<0.000000e+00> : vector<8xf32>
    %24 = vector.multi_reduction <add>, %23, %cst_10 [1] : vector<8x512xf32> to vector<8xf32>
    %25 = vector.shape_cast %24 : vector<8xf32> to vector<8x1xf32>
    %cst_11 = arith.constant dense<0.000000e+00> : vector<8xf32>
    %26 = vector.multi_reduction <add>, %11, %cst_11 [1] : vector<8x512xf32> to vector<8xf32>
    %27 = vector.shape_cast %26 : vector<8xf32> to vector<8x1xf32>
    %cst_12 = arith.constant dense<0.000000e+00> : vector<8xf32>
    %28 = vector.multi_reduction <add>, %12, %cst_12 [1] : vector<8x512xf32> to vector<8xf32>
    %29 = vector.shape_cast %28 : vector<8xf32> to vector<8x1xf32>
    %cst_13 = arith.constant dense<0.000000e+00> : vector<8xf32>
    %30 = vector.multi_reduction <add>, %10, %cst_13 [1] : vector<8x512xf32> to vector<8xf32>
    %31 = vector.shape_cast %30 : vector<8xf32> to vector<8x1xf32>
    %32 = tpu.iota {dimensions = array<i32: 1>} : vector<8x128xi32>
    %c0_i32 = arith.constant 0 : i32
    %33 = vector.broadcast %c0_i32 : i32 to vector<8x128xi32>
    %34 = arith.cmpi eq, %32, %33 : vector<8x128xi32>
    %cst_14 = arith.constant 0.000000e+00 : f32
    %35 = vector.shape_cast %14 : vector<8x1xf32> to vector<8x1xf32>
    %36 = vector.broadcast %35 : vector<8x1xf32> to vector<8x128xf32>
    %37 = vector.broadcast %cst_14 : f32 to vector<8x128xf32>
    %38 = arith.select %34, %36, %37 : vector<8x128xi1>, vector<8x128xf32>
    %c1_i32 = arith.constant 1 : i32
    %39 = vector.broadcast %c1_i32 : i32 to vector<8x128xi32>
    %40 = arith.cmpi eq, %32, %39 : vector<8x128xi32>
    %cst_15 = arith.constant 0.000000e+00 : f32
    %41 = vector.shape_cast %16 : vector<8x1xf32> to vector<8x1xf32>
    %42 = vector.broadcast %41 : vector<8x1xf32> to vector<8x128xf32>
    %43 = vector.broadcast %cst_15 : f32 to vector<8x128xf32>
    %44 = arith.select %40, %42, %43 : vector<8x128xi1>, vector<8x128xf32>
    %45 = arith.addf %38, %44 : vector<8x128xf32>
    %c2_i32 = arith.constant 2 : i32
    %46 = vector.broadcast %c2_i32 : i32 to vector<8x128xi32>
    %47 = arith.cmpi eq, %32, %46 : vector<8x128xi32>
    %cst_16 = arith.constant 0.000000e+00 : f32
    %48 = vector.shape_cast %19 : vector<8x1xf32> to vector<8x1xf32>
    %49 = vector.broadcast %48 : vector<8x1xf32> to vector<8x128xf32>
    %50 = vector.broadcast %cst_16 : f32 to vector<8x128xf32>
    %51 = arith.select %47, %49, %50 : vector<8x128xi1>, vector<8x128xf32>
    %52 = arith.addf %45, %51 : vector<8x128xf32>
    %c3_i32 = arith.constant 3 : i32
    %53 = vector.broadcast %c3_i32 : i32 to vector<8x128xi32>
    %54 = arith.cmpi eq, %32, %53 : vector<8x128xi32>
    %cst_17 = arith.constant 0.000000e+00 : f32
    %55 = vector.shape_cast %22 : vector<8x1xf32> to vector<8x1xf32>
    %56 = vector.broadcast %55 : vector<8x1xf32> to vector<8x128xf32>
    %57 = vector.broadcast %cst_17 : f32 to vector<8x128xf32>
    %58 = arith.select %54, %56, %57 : vector<8x128xi1>, vector<8x128xf32>
    %59 = arith.addf %52, %58 : vector<8x128xf32>
    %c4_i32 = arith.constant 4 : i32
    %60 = vector.broadcast %c4_i32 : i32 to vector<8x128xi32>
    %61 = arith.cmpi eq, %32, %60 : vector<8x128xi32>
    %cst_18 = arith.constant 0.000000e+00 : f32
    %62 = vector.shape_cast %25 : vector<8x1xf32> to vector<8x1xf32>
    %63 = vector.broadcast %62 : vector<8x1xf32> to vector<8x128xf32>
    %64 = vector.broadcast %cst_18 : f32 to vector<8x128xf32>
    %65 = arith.select %61, %63, %64 : vector<8x128xi1>, vector<8x128xf32>
    %66 = arith.addf %59, %65 : vector<8x128xf32>
    %c5_i32 = arith.constant 5 : i32
    %67 = vector.broadcast %c5_i32 : i32 to vector<8x128xi32>
    %68 = arith.cmpi eq, %32, %67 : vector<8x128xi32>
    %cst_19 = arith.constant 0.000000e+00 : f32
    %69 = vector.shape_cast %27 : vector<8x1xf32> to vector<8x1xf32>
    %70 = vector.broadcast %69 : vector<8x1xf32> to vector<8x128xf32>
    %71 = vector.broadcast %cst_19 : f32 to vector<8x128xf32>
    %72 = arith.select %68, %70, %71 : vector<8x128xi1>, vector<8x128xf32>
    %73 = arith.addf %66, %72 : vector<8x128xf32>
    %c6_i32 = arith.constant 6 : i32
    %74 = vector.broadcast %c6_i32 : i32 to vector<8x128xi32>
    %75 = arith.cmpi eq, %32, %74 : vector<8x128xi32>
    %cst_20 = arith.constant 0.000000e+00 : f32
    %76 = vector.shape_cast %29 : vector<8x1xf32> to vector<8x1xf32>
    %77 = vector.broadcast %76 : vector<8x1xf32> to vector<8x128xf32>
    %78 = vector.broadcast %cst_20 : f32 to vector<8x128xf32>
    %79 = arith.select %75, %77, %78 : vector<8x128xi1>, vector<8x128xf32>
    %80 = arith.addf %73, %79 : vector<8x128xf32>
    %c7_i32 = arith.constant 7 : i32
    %81 = vector.broadcast %c7_i32 : i32 to vector<8x128xi32>
    %82 = arith.cmpi eq, %32, %81 : vector<8x128xi32>
    %cst_21 = arith.constant 0.000000e+00 : f32
    %83 = vector.shape_cast %31 : vector<8x1xf32> to vector<8x1xf32>
    %84 = vector.broadcast %83 : vector<8x1xf32> to vector<8x128xf32>
    %85 = vector.broadcast %cst_21 : f32 to vector<8x128xf32>
    %86 = arith.select %82, %84, %85 : vector<8x128xi1>, vector<8x128xf32>
    %87 = arith.addf %80, %86 : vector<8x128xf32>
    %c0_i32_22 = arith.constant 0 : i32
    %88 = arith.cmpi eq, %arg1, %c0_i32_22 : i32
    %89 = arith.extui %88 : i1 to i32
    %c0_i32_23 = arith.constant 0 : i32
    %90 = arith.cmpi ne, %89, %c0_i32_23 : i32
    scf.if %90 {
      %cst_28 = arith.constant 0.000000e+00 : f32
      %94 = vector.broadcast %cst_28 : f32 to vector<8x128xf32>
      %c0_29 = arith.constant 0 : index
      %c0_30 = arith.constant 0 : index
      %95 = vector.load %arg4[%c0_29, %c0_30] : memref<8x128xf32, #tpu.memory_space<vmem>>, vector<8x128xf32>
      tpu.vector_store %arg4[%c0_29, %c0_30], %94 {strides = array<i32>} : memref<8x128xf32, #tpu.memory_space<vmem>>, vector<8x128xf32>,
    } else {
    }
    %c0_24 = arith.constant 0 : index
    %c0_25 = arith.constant 0 : index
    %91 = vector.load %arg4[%c0_24, %c0_25] : memref<8x128xf32, #tpu.memory_space<vmem>>, vector<8x128xf32>
    %92 = arith.addf %91, %87 : vector<8x128xf32>
    %c0_26 = arith.constant 0 : index
    %c0_27 = arith.constant 0 : index
    %93 = vector.load %arg4[%c0_26, %c0_27] : memref<8x128xf32, #tpu.memory_space<vmem>>, vector<8x128xf32>
    tpu.vector_store %arg4[%c0_26, %c0_27], %92 {strides = array<i32>} : memref<8x128xf32, #tpu.memory_space<vmem>>, vector<8x128xf32>,
    return
  }
  func.func @transform_0(%arg0: i32, %arg1: i32) -> (i32, i32) {
    %c0_i32 = arith.constant 0 : i32
    return %arg0, %arg1 : i32, i32
  }
  func.func @transform_1(%arg0: i32, %arg1: i32) -> (i32, i32) {
    %c0_i32 = arith.constant 0 : i32
    return %arg0, %arg1 : i32, i32
  }
  func.func @transform_2(%arg0: i32, %arg1: i32) -> (i32, i32) {
    %c0_i32 = arith.constant 0 : i32
    %c0_i32_0 = arith.constant 0 : i32
    return %arg0, %c0_i32 : i32, i32
  }
  func.func @transform_3(%arg0: i32, %arg1: i32) -> (i32, i32) {
    %c0_i32 = arith.constant 0 : i32
    return %arg0, %arg1 : i32, i32
  }
}

</mosaic_0001>

<bundles_post_ra>
// kernel: masked_ncc.1
= control target key start
LH: loop header
LB: loop body
LE: loop exit
PB: predicated region body
PF: predicated region fallthrough
CT: control target
= control target key end

     0   :  { %v170_v14 = vmov 0.0   ;;  %v171_v37 = vmov 0   ;;  %s261_s0 = inlined_call_operand.vmem [shape: f32[8,512], index: 0, kind: input, shape index: {}]   ;;  %s262_s1 = inlined_call_operand.vmem [shape: f32[8,512], index: 1, kind: input, shape index: {}]   ;;  %s263_s3 = inlined_call_operand.vmem [shape: s8[8,512], index: 3, kind: output, shape index: {1}]   ;;  %s264_s2 = inlined_call_operand.vmem [shape: f32[8,128], index: 2, kind: output, shape index: {0}]  }
   0x1   :  { %v15_v0 = vld [vmem:[%s261_s0] sm:$0xff]  ;;  %v16_v1 = vld [vmem:[%s261_s0 + $0x8] sm:$0xff]  ;;  %v17_v2 = vld [vmem:[%s261_s0 + $0x10] sm:$0xff] }
   0x2   :  { %v18_v3 = vld [vmem:[%s261_s0 + $0x18] sm:$0xff]  ;;  %vm24_vm0 = vcmp.ne.f32.partialorder %v16_v1, 0.0  ;;  %v71_v4 = vadd.f32 %v16_v1, %v15_v0  ;;  %vm23_vm1 = vcmp.ne.f32.partialorder %v15_v0, 0.0  ;;  %v19_v5 = vld [vmem:[%s262_s1] sm:$0xff]  ;;  %v20_v6 = vld [vmem:[%s262_s1 + $0x8] sm:$0xff]  ;;  %vm25_vm2 = vcmp.ne.f32.partialorder %v17_v2, 0.0 }
   0x3   :  { %v21_v7 = vld [vmem:[%s262_s1 + $0x10] sm:$0xff]  ;;  %v22_v8 = vld [vmem:[%s262_s1 + $0x18] sm:$0xff]  ;;  %v76_v9 = vadd.f32 %v20_v6, %v19_v5  ;;  %vm27_vm3 = vcmp.ne.f32.partialorder %v19_v5, 0.0  ;;  %vm28_vm4 = vcmp.ne.f32.partialorder %v20_v6, 0.0  ;;  %vm26_vm5 = vcmp.ne.f32.partialorder %v18_v3, 0.0 }
   0x4   :  { %v72_v10 = vadd.f32 %v71_v4, %v17_v2  ;;  %vm29_vm6 = vcmp.ne.f32.partialorder %v21_v7, 0.0  ;;  %vm30_vm7 = vcmp.ne.f32.partialorder %v22_v8, 0.0  ;;  %vm216_vm8 = vmand %vm23_vm1, %vm27_vm3 }
   0x5   :  { %v77_v12 = vadd.f32 %v76_v9, %v21_v7  ;;  %vm221_vm9 = vmand %vm24_vm0, %vm28_vm4  ;;  %v164_v15 = vsel %vm216_vm8, 1.0, %v170_v14  ;;  %v123_v9 = vlaneseq }
   0x6   :  { %v73_v16 = vadd.f32 %v72_v10, %v18_v3  ;;  %vm228_vm10 = vmand %vm25_vm2, %vm29_vm6  ;;  %v165_v18 = vsel %vm221_vm9, 1.0, %v170_v14  ;;  %v63_v19 = vmul.f32 %v164_v15, %v15_v0  ;;  %v67_v20 = vmul.f32 %v164_v15, %v19_v5 }
   0x7   :  { %v78_v21 = vadd.f32 %v77_v12, %v22_v8  ;;  %vm235_vm11 = vmand %vm26_vm5, %vm30_vm7  ;;  %v166_v23 = vsel %vm228_vm10, 1.0, %v170_v14  ;;  %v64_v24 = vmul.f32 %v165_v18, %v16_v1  ;;  %v68_v25 = vmul.f32 %v165_v18, %v20_v6 }
   0x8   :  { %74 = vadd.xlane.f32.xlu0 %v73_v16  ;;  %vm37_vm12 = vmpackc.low %vm221_vm9, %vm221_vm9  ;;  %v167_v26 = vsel %vm235_vm11, 1.0, %v170_v14  ;;  %v65_v27 = vmul.f32 %v166_v23, %v17_v2  ;;  %v81_v28 = vmul.f32 %v63_v19, %v15_v0  ;;  %v69_v29 = vmul.f32 %v166_v23, %v21_v7 }
   0x9   :  { %vm38_vm13 = vmpackc.even %vm37_vm12, %vm37_vm12  ;;  %v66_v30 = vmul.f32 %v167_v26, %v18_v3  ;;  %v82_v31 = vmul.f32 %v64_v24, %v16_v1  ;;  %v70_v32 = vmul.f32 %v167_v26, %v22_v8  ;;  %v90_v33 = vmul.f32 %v67_v20, %v19_v5 }
   0xa   :  { %vm39_vm14 = vmpackc.low %vm228_vm10, %vm228_vm10  ;;  %v83_v34 = vmul.f32 %v65_v27, %v17_v2  ;;  %v91_v35 = vmul.f32 %v68_v25, %v20_v6  ;;  %v92_v36 = vmul.f32 %v69_v29, %v21_v7  ;;  %v44_v38 = vsel %vm38_vm13, 16843009, %v171_v37 }
   0xb   :  { %vm40_vm15 = vmpackc.even %vm39_vm14, %vm39_vm14  ;;  %v84_v39 = vmul.f32 %v66_v30, %v18_v3  ;;  %v85_v40 = vadd.f32 %v82_v31, %v81_v28  ;;  %v93_v41 = vmul.f32 %v70_v32, %v22_v8  ;;  %v99_v44 = vmul.f32 %v63_v19, %v19_v5 }
   0xc   :  { %79 = vadd.xlane.f32.xlu0 %v78_v21  ;;  %vm41_vm0 = vmpackc.low %vm235_vm11, %vm235_vm11  ;;  %v45_v42 = vsel %vm40_vm15, 16843009, %v171_v37  ;;  %v94_v43 = vadd.f32 %v91_v35, %v90_v33  ;;  %v100_v45 = vmul.f32 %v64_v24, %v20_v6  ;;  %v101_v48 = vmul.f32 %v65_v27, %v21_v7 }
   0xd   :  { %vm42_vm1 = vmpackc.even %vm41_vm0, %vm41_vm0  ;;  %v49_v46 = vunpack.c.0.s8 %v45_v42  ;;  %v86_v47 = vadd.f32 %v85_v40, %v83_v34  ;;  %v102_v49 = vmul.f32 %v66_v30, %v22_v8  ;;  %v108_v53 = vadd.f32 %v64_v24, %v63_v19 }
   0xe   :  { %v46_v50 = vsel %vm42_vm1, 16843009, %v171_v37  ;;  %vm35_vm2 = vmpackc.low %vm216_vm8, %vm216_vm8  ;;  %v95_v51 = vadd.f32 %v94_v43, %v92_v36  ;;  %v103_v52 = vadd.f32 %v100_v45, %v99_v44  ;;  %v48_v54 = vunpack.c.0.s8 %v44_v38 }
   0xf   :  { %v50_v55 = vunpack.c.0.s8 %v46_v50  ;;  %v87_v56 = vadd.f32 %v86_v47, %v84_v39  ;;  %vm36_vm3 = vmpackc.even %vm35_vm2, %vm35_vm2  ;;  %v113_v57 = vadd.f32 %v68_v25, %v67_v20  ;;  %v118_v61 = vadd.f32 %v165_v18, %v164_v15 }
  0x10   :  { %v43_v58 = vsel %vm36_vm3, 16843009, %v171_v37  ;;  %v96_v59 = vadd.f32 %v95_v51, %v93_v41  ;;  %v104_v60 = vadd.f32 %v103_v52, %v101_v48  ;;  %v109_v0 = vadd.f32 %v108_v53, %v65_v27 }
  0x11   :  { %v52_v62 = vpack.c.b16 %v50_v55, %v49_v46  ;;  %88 = vadd.xlane.f32.xlu1 %v87_v56  ;;  %v47_v63 = vunpack.c.0.s8 %v43_v58  ;;  %v114_v1 = vadd.f32 %v113_v57, %v69_v29  ;;  %v119_v7 = vadd.f32 %v166_v23, %v118_v61 }
  0x12   :  { %v105_v2 = vadd.f32 %v104_v60, %v102_v49  ;;  %v110_v6 = vadd.f32 %v109_v0, %v66_v30  ;;  %v124_v10 = vand.u32 127, %v123_v9 }
  0x13   :  { %v51_v3 = vpack.c.b16 %v48_v54, %v47_v63  ;;  %v115_v4 = vadd.f32 %v114_v1, %v70_v32  ;;  %v120_v8 = vadd.f32 %v167_v26, %v119_v7 }
  0x14   :  { %106 = vadd.xlane.f32.xlu0 %v105_v2  ;;  %vm125_vm4 = vcmp.eq.s32.totalorder %v124_v10, 0  ;;  %vm127_vm5 = vcmp.eq.s32.totalorder %v124_v10, 1  ;;  %vm130_vm6 = vcmp.eq.s32.totalorder %v124_v10, 2  ;;  %vm133_vm7 = vcmp.eq.s32.totalorder %v124_v10, 3 }
  0x15   :  { %v53_v5 = vpack.c.b8 %v52_v62, %v51_v3  ;;  %97 = vadd.xlane.f32.xlu1 %v96_v59  ;;  %vm136_vm8 = vcmp.eq.s32.totalorder %v124_v10, 4  ;;  %vm139_vm9 = vcmp.eq.s32.totalorder %v124_v10, 5  ;;  %vm142_vm10 = vcmp.eq.s32.totalorder %v124_v10, 6 }
  0x16   :  { %vm145_vm11 = vcmp.eq.s32.totalorder %v124_v10, 7 }
  0x17   :  { %54 = vst [vmem:[%s263_s3] sm:$0xff] %v53_v5 }
  0x18   :  { %116 = vadd.xlane.f32.xlu0 %v115_v4 }
  0x19   :  { %111 = vadd.xlane.f32.xlu1 %v110_v6 }
  0x1d   :  { %121 = vadd.xlane.f32.xlu1 %v120_v8 }
  0x95   :  { %v75_v11 = vpop.xlane.xlu0 %74 }
  0x96   :  { %v126_v13 = vsel %vm125_vm4, %v75_v11, 0.0 }
  0x99   :  { %v80_v12 = vpop.xlane.xlu0 %79 }
  0x9a   :  { %v128_v14 = vsel %vm127_vm5, %v80_v12, 0.0 }
  0x9b   :  { %v129_v15 = vadd.f32 %v128_v14, %v126_v13 }
  0x9e   :  { %v89_v16 = vpop.xlane.xlu1 %88 }
  0x9f   :  { %v131_v17 = vsel %vm130_vm6, %v89_v16, 0.0 }
  0xa0   :  { %v132_v19 = vadd.f32 %v131_v17, %v129_v15 }
  0xa1   :  { %v107_v18 = vpop.xlane.xlu0 %106 }
  0xa2   :  { %v98_v20 = vpop.xlane.xlu1 %97  ;;  %v137_v22 = vsel %vm136_vm8, %v107_v18, 0.0 }
  0xa3   :  { %v134_v21 = vsel %vm133_vm7, %v98_v20, 0.0 }
  0xa4   :  { %v135_v23 = vadd.f32 %v134_v21, %v132_v19 }
  0xa5   :  { %v117_v24 = vpop.xlane.xlu0 %116 }
  0xa6   :  { %v138_v25 = vadd.f32 %v137_v22, %v135_v23  ;;  %v112_v26 = vpop.xlane.xlu1 %111  ;;  %v143_v28 = vsel %vm142_vm10, %v117_v24, 0.0 }
  0xa7   :  { %v140_v27 = vsel %vm139_vm9, %v112_v26, 0.0 }
  0xa8   :  { %v141_v29 = vadd.f32 %v140_v27, %v138_v25 }
  0xaa   :  { %v144_v30 = vadd.f32 %v143_v28, %v141_v29  ;;  %v122_v31 = vpop.xlane.xlu1 %121 }
  0xab   :  { %v146_v32 = vsel %vm145_vm11, %v122_v31, 0.0 }
  0xac   :  { %v147_v33 = vadd.f32 %v146_v32, %v144_v30 }
  0xae   :  { %155 = vst [vmem:[%s264_s2] sm:$0xff] %v147_v33 }

</bundles_post_ra>
